<compile_context>
chip_gen: v5e
topology: v5e:2x2
jax: 0.10.0
libtpu: 0.0.40
codegen_flags: <defaults>
</compile_context>

<pallas_src>
import numpy as np
import jax
import jax.numpy as jnp
from jax import lax
from jax.experimental import pallas as pl
from jax.experimental.pallas import tpu as pltpu


def make_dct_matrix(n: int) -> np.ndarray:
    """Orthonormal DCT-II matrix D with D[k, i] = s_k * cos(pi*(2i+1)*k/(2n))."""
    k = np.arange(n)[:, None].astype(np.float64)
    i = np.arange(n)[None, :].astype(np.float64)
    d = np.cos(np.pi * (2.0 * i + 1.0) * k / (2.0 * n)) * np.sqrt(2.0 / n)
    d[0, :] *= 1.0 / np.sqrt(2.0)
    return d


def make_freqs_squared_1d(n: int) -> np.ndarray:
    """freqs_k^2 with freqs = pi * linspace(0, n-1, n) / n (module definition)."""
    freqs = np.pi * np.linspace(0.0, n - 1.0, n) / n
    return freqs ** 2


def _pick_group_size(batch: int, bytes_per_batch: int) -> int:
    """Batches per grid step: target >=512 KiB blocks, keep >=2 grid steps."""
    target = 512 * 1024
    g = max(1, min(batch, target // max(bytes_per_batch, 1)))
    if batch >= 2:
        # v7x has 2 TensorCores per chip; never collapse everything into 1 step.
        g = min(g, (batch + 1) // 2)
    return int(g)


def dct_blur(x, blur_sigmas, fwd_steps):
    """x: [B, C, H, W] (or [B, H, W]); fwd_steps: [B] int32. Returns same shape."""
    squeeze_channel = False
    if x.ndim == 3:
        x = x[:, None]
        squeeze_channel = True
    B, C, H, W = x.shape
    assert H == W, "square images assumed (image_size x image_size)"
    CH = C * H

    sigmas = blur_sigmas[fwd_steps].astype(jnp.float32)      # [B]
    t = (sigmas ** 2) / 2.0                                  # [B]

    d = jnp.asarray(make_dct_matrix(H), jnp.float32)              # (H, H)
    f2col = jnp.asarray(make_freqs_squared_1d(H)[:, None],
                        jnp.float32)                               # (H, 1)

    # Channels-on-sublanes slab: contiguous reshape, zero HBM copies.
    x_slab = x.reshape(B, CH, W)

    G = _pick_group_size(B, C * H * W * x.dtype.itemsize)
    n_steps = (B + G - 1) // G
    Bp = n_steps * G
    if Bp != B:
        # Pad the tail group; padded planes are computed (cheap) and sliced off.
        x_slab = jnp.pad(x_slab, ((0, Bp - B), (0, 0), (0, 0)))
        t = jnp.pad(t, (0, Bp - B))

    def kernel(t_ref, x_ref, d_ref, f2_ref, o_ref):
        # t_ref : SMEM scalar prefetch [Bp]  (t = sigma^2/2 per batch)
        # x_ref : (G, C*H, W) slab, channels stacked along sublanes
        # d_ref : (H, H) orthonormal DCT-II matrix D
        # f2_ref: (H, 1) freqs^2 column
        # o_ref : (G, C*H, W)
        step = pl.program_id(0)
        dmat = d_ref[...]
        f2 = f2_ref[...]

        def body(g, carry):
            tb = t_ref[step * G + g]
            a = jnp.exp(-f2 * tb)                                  # (H, 1), EUP
            # M = D^T diag(a) D  ==  (a*D)^T @ D   (symmetric, per batch)
            m = lax.dot_general(a * dmat, dmat,
                                dimension_numbers=(((0,), (0,)), ((), ())),
                                preferred_element_type=jnp.float32)  # (H, H)
            xg = x_ref[g].astype(jnp.float32)                      # (C*H, W)
            # Width pass: one tall matmul covering all channels at once.
            u = jnp.dot(xg, m, preferred_element_type=jnp.float32)  # (C*H, W)
            # Height pass: per-channel (static unrolled) M @ U_c.
            for c in range(C):
                blk = u[c * H:(c + 1) * H, :]
                o_ref[g, c * H:(c + 1) * H, :] = jnp.dot(
                    m, blk, preferred_element_type=jnp.float32
                ).astype(o_ref.dtype)
            return carry

        lax.fori_loop(0, G, body, 0, unroll=True)

    grid_spec = pltpu.PrefetchScalarGridSpec(
        num_scalar_prefetch=1,
        grid=(n_steps,),
        in_specs=[
            pl.BlockSpec((G, CH, W), lambda i, t_ref: (i, 0, 0)),   # x slab
            pl.BlockSpec((H, H), lambda i, t_ref: (0, 0)),          # D
            pl.BlockSpec((H, 1), lambda i, t_ref: (0, 0)),          # freqs^2
        ],
        out_specs=pl.BlockSpec((G, CH, W), lambda i, t_ref: (i, 0, 0)),
    )

    # VMEM per step: 2 x (in + out) blocks of G*C*H*W*4 B (G capped near 512 KiB)
    # plus the tiny (H,H) constant -> well inside v7x's 32 MiB scoped default.
    y_slab = pl.pallas_call(
        kernel,
        out_shape=jax.ShapeDtypeStruct((Bp, CH, W), x.dtype),
        grid_spec=grid_spec,
        compiler_params=pltpu.CompilerParams(
            dimension_semantics=("parallel",)),
    )(t, x_slab, d, f2col)

    y = y_slab[:B].reshape(B, C, H, W)
    if squeeze_channel:
        y = y[:, 0]
    return y


def dct_blur_reference(x, blur_sigmas, fwd_steps):
    """Pure-JAX reference: DCT2 (D X D^T) -> gaussian attenuation -> IDCT2 (D^T C D)."""
    B, C, H, W = x.shape
    d = jnp.asarray(make_dct_matrix(H), jnp.float32)
    f2_1d = jnp.asarray(make_freqs_squared_1d(H), jnp.float32)
    freqs_squared = f2_1d[:, None] + f2_1d[None, :]
    sigmas = blur_sigmas[fwd_steps][:, None, None, None].astype(jnp.float32)
    t = sigmas ** 2 / 2.0
    coefs = jnp.einsum("ph,bchw,qw->bcpq", d, x, d)           # D X D^T
    coefs = coefs * jnp.exp(-freqs_squared[None, None] * t)
    return jnp.einsum("ph,bcpq,qw->bchw", d, coefs, d)        # D^T C D


if __name__ == "__main__":
    B, C, H = 2, 4, 16
    num_steps = 10

    key = jax.random.PRNGKey(0)
    kx, ks = jax.random.split(key)
    x = jax.random.normal(kx, (B, C, H, H), dtype=jnp.float32)
    fwd_steps = jax.random.randint(ks, (B,), 0, num_steps, dtype=jnp.int32)

    # deterministic parameter init: blur_sigmas [num_steps]
    blur_sigmas = jnp.exp(
        jnp.linspace(jnp.log(0.5), jnp.log(5.0), num_steps)
    ).astype(jnp.float32)

    out = dct_blur(x, blur_sigmas, fwd_steps)
    out = jax.block_until_ready(out)

    ref = dct_blur_reference(x, blur_sigmas, fwd_steps)
    np.testing.assert_allclose(np.asarray(out), np.asarray(ref),
                               rtol=1e-4, atol=1e-4)

    print("KERNEL_OK")
</pallas_src>

<mosaic_0001>
module attributes {stable_mosaic.version = 11 : i64} {
  func.func @kernel(%arg0: i32, %arg1: memref<2xf32, #tpu.memory_space<smem>>, %arg2: memref<1x64x16xf32, #tpu.memory_space<vmem>>, %arg3: memref<16x16xf32, #tpu.memory_space<vmem>>, %arg4: memref<16x1xf32, #tpu.memory_space<vmem>>, %arg5: memref<1x64x16xf32, #tpu.memory_space<vmem>>) attributes {dimension_semantics = [#tpu.dimension_semantics<parallel>], iteration_bounds = array<i64: 2>, scalar_prefetch = 1 : i64, scratch_operands = 0 : i64, tpu.core_type = #tpu.core_type<tc>, window_params = [{transform_indices = @transform_0, window_bounds = array<i64: 1, 64, 16>}, {pipeline_mode = #tpu.pipeline_mode<synchronous>, transform_indices = @transform_1, window_bounds = array<i64: 16, 16>}, {pipeline_mode = #tpu.pipeline_mode<synchronous>, transform_indices = @transform_2, window_bounds = array<i64: 16, 1>}, {transform_indices = @transform_3, window_bounds = array<i64: 1, 64, 16>}]} {
    %c0 = arith.constant 0 : index
    %c0_0 = arith.constant 0 : index
    %0 = vector.load %arg3[%c0, %c0_0] : memref<16x16xf32, #tpu.memory_space<vmem>>, vector<16x16xf32>
    %c0_1 = arith.constant 0 : index
    %c0_2 = arith.constant 0 : index
    %1 = vector.load %arg4[%c0_1, %c0_2] : memref<16x1xf32, #tpu.memory_space<vmem>>, vector<16x1xf32>
    %c0_i32 = arith.constant 0 : i32
    %c1_i32 = arith.constant 1 : i32
    %2 = arith.muli %arg0, %c1_i32 : i32
    %3 = arith.addi %2, %c0_i32 : i32
    %4 = arith.index_cast %3 : i32 to index
    %5 = memref.load %arg1[%4] : memref<2xf32, #tpu.memory_space<smem>>
    %cst = arith.constant 0.000000e+00 : f32
    %6 = vector.broadcast %cst : f32 to vector<16x1xf32>
    %7 = arith.subf %6, %1 : vector<16x1xf32>
    %8 = vector.broadcast %5 : f32 to vector<16x1xf32>
    %9 = arith.mulf %7, %8 : vector<16x1xf32>
    %10 = math.exp %9 : vector<16x1xf32>
    %11 = vector.broadcast %10 : vector<16x1xf32> to vector<16x16xf32>
    %12 = arith.mulf %11, %0 : vector<16x16xf32>
    %cst_3 = arith.constant dense<0.000000e+00> : vector<16x16xf32>
    %13 = tpu.matmul %12, %0, %cst_3 {dimension_numbers = #tpu.dot_dimension_numbers<[0], [0], [1], [1], [0, 1, 1, 1], [], []>} : vector<16x16xf32>, vector<16x16xf32>, vector<16x16xf32> -> vector<16x16xf32>
    %14 = arith.index_cast %c0_i32 : i32 to index
    %c0_4 = arith.constant 0 : index
    %c0_5 = arith.constant 0 : index
    %15 = vector.load %arg2[%14, %c0_4, %c0_5] : memref<1x64x16xf32, #tpu.memory_space<vmem>>, vector<1x64x16xf32>
    %16 = vector.shape_cast %15 : vector<1x64x16xf32> to vector<64x16xf32>
    %cst_6 = arith.constant dense<0.000000e+00> : vector<64x16xf32>
    %17 = tpu.matmul %16, %13, %cst_6 {dimension_numbers = #tpu.dot_dimension_numbers<[1], [0], [0], [1], [0, 0, 1, 1], [], []>} : vector<64x16xf32>, vector<16x16xf32>, vector<64x16xf32> -> vector<64x16xf32>
    %18 = vector.extract_strided_slice %17 {offsets = [0, 0], sizes = [16, 16], strides = [1, 1]} : vector<64x16xf32> to vector<16x16xf32>
    %cst_7 = arith.constant dense<0.000000e+00> : vector<16x16xf32>
    %19 = tpu.matmul %13, %18, %cst_7 {dimension_numbers = #tpu.dot_dimension_numbers<[1], [0], [0], [1], [0, 0, 1, 1], [], []>} : vector<16x16xf32>, vector<16x16xf32>, vector<16x16xf32> -> vector<16x16xf32>
    %20 = arith.index_cast %c0_i32 : i32 to index
    %c0_8 = arith.constant 0 : index
    %c0_9 = arith.constant 0 : index
    %21 = vector.load %arg5[%20, %c0_8, %c0_9] : memref<1x64x16xf32, #tpu.memory_space<vmem>>, vector<1x16x16xf32>
    %22 = vector.shape_cast %21 : vector<1x16x16xf32> to vector<16x16xf32>
    %23 = vector.shape_cast %19 : vector<16x16xf32> to vector<1x16x16xf32>
    tpu.vector_store %arg5[%20, %c0_8, %c0_9], %23 {strides = array<i32>} : memref<1x64x16xf32, #tpu.memory_space<vmem>>, vector<1x16x16xf32>,
    %24 = vector.extract_strided_slice %17 {offsets = [16, 0], sizes = [16, 16], strides = [1, 1]} : vector<64x16xf32> to vector<16x16xf32>
    %cst_10 = arith.constant dense<0.000000e+00> : vector<16x16xf32>
    %25 = tpu.matmul %13, %24, %cst_10 {dimension_numbers = #tpu.dot_dimension_numbers<[1], [0], [0], [1], [0, 0, 1, 1], [], []>} : vector<16x16xf32>, vector<16x16xf32>, vector<16x16xf32> -> vector<16x16xf32>
    %26 = arith.index_cast %c0_i32 : i32 to index
    %c16 = arith.constant 16 : index
    %c0_11 = arith.constant 0 : index
    %27 = vector.load %arg5[%26, %c16, %c0_11] : memref<1x64x16xf32, #tpu.memory_space<vmem>>, vector<1x16x16xf32>
    %28 = vector.shape_cast %27 : vector<1x16x16xf32> to vector<16x16xf32>
    %29 = vector.shape_cast %25 : vector<16x16xf32> to vector<1x16x16xf32>
    tpu.vector_store %arg5[%26, %c16, %c0_11], %29 {strides = array<i32>} : memref<1x64x16xf32, #tpu.memory_space<vmem>>, vector<1x16x16xf32>,
    %30 = vector.extract_strided_slice %17 {offsets = [32, 0], sizes = [16, 16], strides = [1, 1]} : vector<64x16xf32> to vector<16x16xf32>
    %cst_12 = arith.constant dense<0.000000e+00> : vector<16x16xf32>
    %31 = tpu.matmul %13, %30, %cst_12 {dimension_numbers = #tpu.dot_dimension_numbers<[1], [0], [0], [1], [0, 0, 1, 1], [], []>} : vector<16x16xf32>, vector<16x16xf32>, vector<16x16xf32> -> vector<16x16xf32>
    %32 = arith.index_cast %c0_i32 : i32 to index
    %c32 = arith.constant 32 : index
    %c0_13 = arith.constant 0 : index
    %33 = vector.load %arg5[%32, %c32, %c0_13] : memref<1x64x16xf32, #tpu.memory_space<vmem>>, vector<1x16x16xf32>
    %34 = vector.shape_cast %33 : vector<1x16x16xf32> to vector<16x16xf32>
    %35 = vector.shape_cast %31 : vector<16x16xf32> to vector<1x16x16xf32>
    tpu.vector_store %arg5[%32, %c32, %c0_13], %35 {strides = array<i32>} : memref<1x64x16xf32, #tpu.memory_space<vmem>>, vector<1x16x16xf32>,
    %36 = vector.extract_strided_slice %17 {offsets = [48, 0], sizes = [16, 16], strides = [1, 1]} : vector<64x16xf32> to vector<16x16xf32>
    %cst_14 = arith.constant dense<0.000000e+00> : vector<16x16xf32>
    %37 = tpu.matmul %13, %36, %cst_14 {dimension_numbers = #tpu.dot_dimension_numbers<[1], [0], [0], [1], [0, 0, 1, 1], [], []>} : vector<16x16xf32>, vector<16x16xf32>, vector<16x16xf32> -> vector<16x16xf32>
    %38 = arith.index_cast %c0_i32 : i32 to index
    %c48 = arith.constant 48 : index
    %c0_15 = arith.constant 0 : index
    %39 = vector.load %arg5[%38, %c48, %c0_15] : memref<1x64x16xf32, #tpu.memory_space<vmem>>, vector<1x16x16xf32>
    %40 = vector.shape_cast %39 : vector<1x16x16xf32> to vector<16x16xf32>
    %41 = vector.shape_cast %37 : vector<16x16xf32> to vector<1x16x16xf32>
    tpu.vector_store %arg5[%38, %c48, %c0_15], %41 {strides = array<i32>} : memref<1x64x16xf32, #tpu.memory_space<vmem>>, vector<1x16x16xf32>,
    %c1_i32_16 = arith.constant 1 : i32
    return
  }
  func.func @transform_0(%arg0: i32, %arg1: memref<2xf32, #tpu.memory_space<smem>>) -> (i32, i32, i32) {
    %c0_i32 = arith.constant 0 : i32
    %c0_i32_0 = arith.constant 0 : i32
    %c0_i32_1 = arith.constant 0 : i32
    return %arg0, %c0_i32, %c0_i32_0 : i32, i32, i32
  }
  func.func @transform_1(%arg0: i32, %arg1: memref<2xf32, #tpu.memory_space<smem>>) -> (i32, i32) {
    %c0_i32 = arith.constant 0 : i32
    %c0_i32_0 = arith.constant 0 : i32
    %c0_i32_1 = arith.constant 0 : i32
    return %c0_i32, %c0_i32_0 : i32, i32
  }
  func.func @transform_2(%arg0: i32, %arg1: memref<2xf32, #tpu.memory_space<smem>>) -> (i32, i32) {
    %c0_i32 = arith.constant 0 : i32
    %c0_i32_0 = arith.constant 0 : i32
    %c0_i32_1 = arith.constant 0 : i32
    return %c0_i32, %c0_i32_0 : i32, i32
  }
  func.func @transform_3(%arg0: i32, %arg1: memref<2xf32, #tpu.memory_space<smem>>) -> (i32, i32, i32) {
    %c0_i32 = arith.constant 0 : i32
    %c0_i32_0 = arith.constant 0 : i32
    %c0_i32_1 = arith.constant 0 : i32
    return %arg0, %c0_i32, %c0_i32_0 : i32, i32, i32
  }
}

</mosaic_0001>

<bundles_post_ra>
// kernel: tpu_custom_call.1
= control target key start
LH: loop header
LB: loop body
LE: loop exit
PB: predicated region body
PF: predicated region fallthrough
CT: control target
= control target key end

     0   :  { %s573_s18 = smov [#allocation3]   ;;  %s670_s0 = inlined_call_operand.vmem [shape: f32[2], index: 0, kind: input, shape index: {}]   ;;  %s671_s1 = inlined_call_operand.vmem [shape: f32[2,64,16], index: 1, kind: input, shape index: {}]   ;;  %s672_s2 = inlined_call_operand.vmem [shape: f32[16,16], index: 2, kind: input, shape index: {}]   ;;  %s673_s3 = inlined_call_operand.vmem [shape: f32[16,1], index: 3, kind: input, shape index: {}]   ;;  %s674_s4 = inlined_call_operand.vmem [shape: f32[2,64,16], index: 4, kind: output, shape index: {}]  }
   0x1   :  { %s10_s17 = sshll.u32 %s670_s0, 4  ;;  %s11_s17 = int_to_ptr.vmem [resolvable:$true] %s10_s17 }
   0x2   :  { %13 = dma.vmem_to_smem %s11_s17, 16, %s573_s18, [#allocation2] }
   0x3   :  { %567 = dma.done.wait [#allocation2], 16 }
   0x4   :  { %568 = vsyncadd [#allocation2], 4294967280 }
   0x5   :  { %16 = sfence }
   0x6   :  { %s603_s19 = smov 0  }
   0x7 LB: > { %s609_s20 = sadd.s32 4294967295, %s571_s19   ;;  %p506_p0 = scmp.ge.s32.totalorder %s571_s19, 1  ;;  %s571_s19 = sphi %s603_s19, %s22_s19  }
   0x8   : > { %p146_p1 = scmp.lt.s32.totalorder %s571_s19, 3 }
   0xa   : > { %p147_p2 = pnand %p506_p0, %p146_p1 }
   0xb   : > { %s184_s22 = sld [smem:[#allocation3 + %s609_s20]] (!%p147_p2)  ;;  %p170_p3 = scmp.lt.s32.totalorder (!%p147_p2), %s609_s20, 1 }
   0xc   : > { %150 = sbr.rel (%p147_p2) target bundleno = 746 (0x2ea), region = 32 }
  0x11   : > { %v182_v0 = vld [vmem:[%s673_s3] sm:$0xff]  ;;  %v574_v1 = vmov 0   ;;  %v183_v2 = vld [vmem:[%s673_s3 + $0x8] sm:$0xff]  ;;  %v187_v5 = vstv %s184_s22  ;;  %vm238_vm0 = vcmask 130048   ;;  %s676_s20 = smov (!%p170_p3, %s609_s20), 1 }
  0x12   : > { %546 = vset.pattern.permute.xlu0 %v574_v1  ;;  %v185_v3 = vsub.f32 0.0, %v182_v0  ;;  %v186_v4 = vsub.f32 0.0, %v183_v2  ;;  %v181_v12 = vld [vmem:[%s672_s2 + $0x8] sm:$0xff]  ;;  %v180_v13 = vld [vmem:[%s672_s2] sm:$0xff]  ;;  %s531_s29 = sshll.u32 %s676_s20, 6 }
  0x13   : > { %259 = vmatpush.msra.mxu0 %v181_v12  ;;  %s174_s6 = scalar_lea.vmem %s671_s1, %s531_s29  ;;  %s179_s9 = scalar_lea.vmem %s674_s4, %s531_s29 }
  0x14   : > { %v188_v6 = vmul.f32 %v187_v5, %v185_v3  ;;  %v189_v7 = vmul.f32 %v187_v5, %v186_v4  ;;  %v268_v22 = vld [vmem:[%s174_s6] sm:$0xff]  ;;  %v273_v23 = vld [vmem:[%s174_s6 + $0x28] sm:$0xff]  ;;  %v274_v25 = vld [vmem:[%s174_s6 + $0x30] sm:$0xff] }
  0x15   : > { %260 = vmatpush.msra.mxu0 %v180_v13  ;;  %v269_v24 = vld [vmem:[%s174_s6 + $0x8] sm:$0xff]  ;;  %v270_v26 = vld [vmem:[%s174_s6 + $0x10] sm:$0xff]  ;;  %v275_v27 = vld [vmem:[%s174_s6 + $0x38] sm:$0xff] }
  0x16   : > { %v190_v8 = vmul.f32 1.442695, %v188_v6  ;;  %v192_v9 = vmul.f32 1.442695, %v189_v7  ;;  %v271_v28 = vld [vmem:[%s174_s6 + $0x18] sm:$0xff]  ;;  %v272_v29 = vld [vmem:[%s174_s6 + $0x20] sm:$0xff] }
  0x18   : > { %547 = vpow2.f32 %v190_v8 }
  0x19   : > { %549 = vpow2.f32 %v192_v9 }
  0x1e   : > { %v548_v10 = vpop.eup %547 }
  0x1f   : > { %196 = vperm.xlu0 %546, %v548_v10   ;;  %v550_v11 = vpop.eup %549 }
  0x27   : > { %201 = vperm.xlu0 %546, %v550_v11  }
  0x91   : > { %v197_v14 = vpop.permute.xlu0 %196 }
  0x92   : > { %v204_v15 = vmul.f32 %v197_v14, %v180_v13 }
  0x94   : > { %206 = vxpose.xlu1.b32.start [1/2] (short) (narrow) %v204_v15, 16 }
  0x99   : > { %v202_v16 = vpop.permute.xlu0 %201 }
  0x9a   : > { %v205_v17 = vmul.f32 %v202_v16, %v181_v12 }
  0x9c   : > { %207 = vxpose.xlu1.b32.end [2/2] (short) (narrow) %v205_v17, 16 }
 0x138   : > { %v222_v18 = vpop.trf.xlu1 }
 0x139   : > { %511 = vmatmul.msk.f32.vlgmr.msra.gmra.mxu0 %vm238_vm0, %v222_v18 }
 0x140   : > { %v223_v19 = vpop.trf.xlu1 }
 0x141   : > { %512 = vmatmul.msk.f32.gmra.mxu0 %vm238_vm0, %v223_v19 }
 0x1b6   : > { %v262_v20 = vpop.f32.mrf.mxu0 }
 0x1be   : > { %v265_v21 = vpop.f32.mrf.mxu0 }
 0x1bf   : > { %314 = vmatpush.msra.mxu1 %v265_v21  ;;  %533 = vmatpush.msra.mxu3 %v265_v21 }
 0x1c1   : > { %315 = vmatpush.msra.mxu1 %v262_v20  ;;  %534 = vmatpush.msra.mxu3 %v262_v20 }
 0x1c2   : > { %513 = vmatmul.msk.f32.vlgmr.msra.gmra.mxu1 %vm238_vm0, %v268_v22  ;;  %518 = vmatmul.msk.f32.vlgmr.msra.gmra.mxu3 %vm238_vm0, %v273_v23 }
 0x1ca   : > { %514 = vmatmul.msk.f32.gmra.mxu1 %vm238_vm0, %v269_v24  ;;  %519 = vmatmul.msk.f32.gmra.mxu3 %vm238_vm0, %v274_v25 }
 0x1d2   : > { %515 = vmatmul.msk.f32.gmra.mxu1 %vm238_vm0, %v270_v26  ;;  %520 = vmatmul.msk.f32.gmra.mxu3 %vm238_vm0, %v275_v27 }
 0x1da   : > { %516 = vmatmul.msk.f32.gmra.mxu1 %vm238_vm0, %v271_v28 }
 0x1e2   : > { %517 = vmatmul.msk.f32.gmra.mxu1 %vm238_vm0, %v272_v29 }
 0x23f   : > { %v317_v30 = vpop.f32.mrf.mxu1 }
 0x245   : > { %v332_v31 = vpop.f32.mrf.mxu3 }
 0x246   : > { %411 = vmatpush.msrb.mxu0 %v332_v31 }
 0x247   : > { %v320_v32 = vpop.f32.mrf.mxu1 }
 0x248   : > { %361 = vmatpush.msra.mxu2 %v320_v32 }
 0x24a   : > { %362 = vmatpush.msra.mxu2 %v317_v30 }
 0x24b   : > { %521 = vmatmul.msk.f32.vlgmr.msra.gmra.mxu2 %vm238_vm0, %v262_v20 }
 0x24d   : > { %v335_v33 = vpop.f32.mrf.mxu3 }
 0x24f   : > { %v323_v34 = vpop.f32.mrf.mxu1 }
 0x253   : > { %522 = vmatmul.msk.f32.gmra.mxu2 %vm238_vm0, %v265_v21 }
 0x255   : > { %v338_v35 = vpop.f32.mrf.mxu3 }
 0x256   : > { %436 = vmatpush.msrb.mxu2 %v338_v35 }
 0x257   : > { %v326_v36 = vpop.f32.mrf.mxu1 }
 0x258   : > { %386 = vmatpush.msrb.mxu3 %v326_v36  ;;  %437 = vmatpush.msrb.mxu2 %v335_v33 }
 0x25a   : > { %387 = vmatpush.msrb.mxu3 %v323_v34 }
 0x25b   : > { %523 = vmatmul.msk.f32.vlgmr.msrb.gmra.mxu3 %vm238_vm0, %v262_v20  ;;  %527 = vmatmul.msk.f32.vlgmr.msrb.gmra.mxu2 %vm238_vm0, %v262_v20 }
 0x25f   : > { %v329_v37 = vpop.f32.mrf.mxu1 }
 0x260   : > { %412 = vmatpush.msrb.mxu0 %v329_v37 }
 0x261   : > { %525 = vmatmul.msk.f32.vlgmr.msrb.gmra.mxu0 %vm238_vm0, %v262_v20 }
 0x263   : > { %524 = vmatmul.msk.f32.gmra.mxu3 %vm238_vm0, %v265_v21  ;;  %528 = vmatmul.msk.f32.gmra.mxu2 %vm238_vm0, %v265_v21 }
 0x269   : > { %526 = vmatmul.msk.f32.gmra.mxu0 %vm238_vm0, %v265_v21 }
 0x2ce   : > { %v364_v38 = vpop.f32.mrf.mxu2 }
 0x2cf   : > { %370 = vst.msk [vmem:[%s179_s9] sm:$0xff] %vm238_vm0, %v364_v38 }
 0x2d6   : > { %v367_v39 = vpop.f32.mrf.mxu2 }
 0x2d7   : > { %371 = vst.msk [vmem:[%s179_s9 + $0x8] sm:$0xff] %vm238_vm0, %v367_v39 }
 0x2de   : > { %v389_v40 = vpop.f32.mrf.mxu3  ;;  %v414_v41 = vpop.f32.mrf.mxu0 }
 0x2df   : > { %395 = vst.msk [vmem:[%s179_s9 + $0x10] sm:$0xff] %vm238_vm0, %v389_v40  ;;  %v439_v42 = vpop.f32.mrf.mxu2 }
 0x2e0   : > { %420 = vst.msk [vmem:[%s179_s9 + $0x20] sm:$0xff] %vm238_vm0, %v414_v41 }
 0x2e1   : > { %445 = vst.msk [vmem:[%s179_s9 + $0x30] sm:$0xff] %vm238_vm0, %v439_v42 }
 0x2e6   : > { %v392_v43 = vpop.f32.mrf.mxu3  ;;  %v417_v44 = vpop.f32.mrf.mxu0 }
 0x2e7   : > { %396 = vst.msk [vmem:[%s179_s9 + $0x18] sm:$0xff] %vm238_vm0, %v392_v43  ;;  %v442_v45 = vpop.f32.mrf.mxu2 }
 0x2e8   : > { %421 = vst.msk [vmem:[%s179_s9 + $0x28] sm:$0xff] %vm238_vm0, %v417_v44 }
 0x2e9   : > { %446 = vst.msk [vmem:[%s179_s9 + $0x38] sm:$0xff] %vm238_vm0, %v442_v45 }
 0x2ea PF: > { %s22_s19 = sadd.s32 1, %s571_s19  }
 0x2eb   : > { %p19_p4 = scmp.ge.s32.totalorder %s22_s19, 4  }
 0x2ed   :  { %21 = sbr.rel (!%p19_p4) target bundleno = 7 (0x7), region = 62 }

</bundles_post_ra>
